<compile_context>
chip_gen: v7x
topology: tpu7x:2x2x1
jax: 0.10.0
libtpu: 0.0.40
codegen_flags: <defaults>
</compile_context>

<pallas_src>
import functools

import jax
import jax.numpy as jnp
from jax import lax
from jax.experimental import pallas as pl
from jax.experimental.pallas import tpu as pltpu

LANES = 128
# Per-input, per-pipeline-buffer byte budget for one row tile.
# 2 inputs x 2 buffers x 2 MiB = 8 MiB resident.
TARGET_BLOCK_BYTES = 2 * 1024 * 1024
VMEM_LIMIT_BYTES = 32 * 1024 * 1024   # explicit scoped-VMEM request; safe on v5e/v6e/v7x
MAX_RAGGED_COLS = 8192                # ragged path must fit one full-width row block in VMEM


def _num_splits_for_device() -> int:
    """2-way leading 'parallel' split only where one device exposes 2 TensorCores
    (v7x) or a fused megacore (v4/v5p). On single-TC v5e/v6e the split is just a
    serial loop (duplicate-block DMA + extra reduces) — pure overhead."""
    try:
        dev = jax.local_devices()[0]
        if dev.platform != "tpu":
            return 1
        kind = str(getattr(dev, "device_kind", "")).lower()
        if ("v7" in kind) or ("7x" in kind) or ("v4" in kind) or ("v5p" in kind):
            return 2
    except Exception:
        pass
    return 1


def _mse_partial_kernel(p_ref, t_ref, o_ref, acc_ref, *,
                        rows, block_rows, cols, steps, nblocks,
                        acc_rows, has_clamped):
    s = pl.program_id(0)      # split: 'parallel' (sharded across TCs where present)
    i = pl.program_id(1)      # step within split: serial reduction
    blk = s * steps + i       # unclamped logical row-block index

    # Reset this split's accumulator at the start of the split.
    @pl.when(i == 0)
    def _():
        acc_ref[...] = jnp.zeros_like(acc_ref)

    def accumulate(mask_rows):
        d = p_ref[...].astype(jnp.float32) - t_ref[...].astype(jnp.float32)
        sq = d * d
        if mask_rows:
            # Only the single partial boundary block pays for the iota/where.
            row_ids = blk * block_rows + lax.broadcasted_iota(
                jnp.int32, (block_rows, cols), 0)
            sq = jnp.where(row_ids < rows, sq, 0.0)
        if acc_rows > 1:
            # Sublane-aligned partial sums: plain VPU vreg adds every step;
            # the intra-vreg (XLU) collapse happens once per split, below.
            acc_ref[...] += jnp.sum(
                sq.reshape(block_rows // acc_rows, acc_rows, cols), axis=0)
        else:
            acc_ref[...] += jnp.sum(sq, axis=0, keepdims=True)

    ragged_rows = (rows % block_rows) != 0    # static python bool

    if (not ragged_rows) and (not has_clamped):
        # Hot path: every block is full and real -> no masking, no gating.
        accumulate(False)
    else:
        last = nblocks - 1

        @pl.when(blk < last)          # interior blocks: unmasked
        def _():
            accumulate(False)

        @pl.when(blk == last)         # boundary block: masked only if partial
        def _():
            accumulate(ragged_rows)
        # blk > last: clamped duplicate block -> compute skipped entirely.

    # Single cross-lane/sublane reduce + scalar SMEM store per split.
    @pl.when(i == steps - 1)
    def _():
        o_ref[0, 0] = jnp.sum(acc_ref[...])


def _sum_sq_diff_2d(p2, t2):
    """Sum of squared differences over a 2-D array pair (tiled Pallas reduction)."""
    rows, cols = p2.shape
    itemsize = max(jnp.dtype(p2.dtype).itemsize, jnp.dtype(t2.dtype).itemsize)
    cols_padded = ((cols + LANES - 1) // LANES) * LANES

    # Row-tile: as large as fits the per-buffer byte budget (multiple of 16 for
    # packed bf16/f32 sublanes), or the full extent when the array is small.
    br = TARGET_BLOCK_BYTES // (cols_padded * itemsize)
    br = max(16, (br // 16) * 16)
    if rows <= br:
        block_rows = rows             # full-extent block: always a legal shape
        nblocks = 1
    else:
        block_rows = br
        nblocks = pl.cdiv(rows, block_rows)

    num_splits = _num_splits_for_device()
    if nblocks < 2 * num_splits:      # not enough blocks to be worth splitting
        num_splits = 1
    steps = pl.cdiv(nblocks, num_splits)
    has_clamped = (num_splits * steps) != nblocks

    # (8, cols) accumulator on the lane-dense path; (1, cols) otherwise.
    acc_rows = 8 if (block_rows % 8 == 0 and cols % LANES == 0) else 1

    def in_map(s, i):
        # Clamp so duplicate trailing blocks (nblocks % num_splits != 0) stay
        # in bounds; the kernel skips their compute entirely.
        return (jnp.minimum(s * steps + i, nblocks - 1), 0)

    kernel = functools.partial(
        _mse_partial_kernel,
        rows=rows, block_rows=block_rows, cols=cols, steps=steps,
        nblocks=nblocks, acc_rows=acc_rows, has_clamped=has_clamped)

    partials = pl.pallas_call(
        kernel,
        out_shape=jax.ShapeDtypeStruct((num_splits, 1), jnp.float32),
        grid_spec=pltpu.PrefetchScalarGridSpec(
            num_scalar_prefetch=0,
            grid=(num_splits, steps),
            in_specs=[
                # TODO(synk): optional pipeline_mode=pl.Buffered(3) on v7x to
                # hide DMA issue jitter at 3.2 TB/s.
                pl.BlockSpec((block_rows, cols), in_map),
                pl.BlockSpec((block_rows, cols), in_map),
            ],
            out_specs=pl.BlockSpec(
                (1, 1), lambda s, i: (s, 0), memory_space=pltpu.SMEM),
            scratch_shapes=[pltpu.VMEM((acc_rows, cols), jnp.float32)],
        ),
        compiler_params=pltpu.CompilerParams(
            # Leading split axis marked 'parallel' -> megacore / 2-TC sharding
            # where available (num_splits is already 1 on 1-TC chips).
            # TODO(synk): if a v7x profile shows one TC idle, switch to
            # (pltpu.CORE_PARALLEL, pltpu.ARBITRARY) or pl.core_map.
            dimension_semantics=("parallel", "arbitrary"),
            vmem_limit_bytes=VMEM_LIMIT_BYTES,
        ),
    )(p2, t2)

    return jnp.sum(partials)


def mse_loss_pallas(pred, target, reduction="mean"):
    """Matches torch.nn.MSELoss(reduction=reduction) for 'mean' and 'sum'."""
    assert pred.shape == target.shape, "pred/target must have identical shapes"
    assert reduction in ("mean", "sum"), "only 'mean' and 'sum' supported"
    # TODO(synk): reduction='none' (elementwise loss map) not implemented.

    pred = jnp.asarray(pred)
    target = jnp.asarray(target)
    n = pred.size
    out_dtype = jnp.result_type(pred.dtype, target.dtype)

    if n == 0:
        d = pred.astype(jnp.float32) - target.astype(jnp.float32)
        total = jnp.sum(d * d)
        loss = total if reduction == "sum" else total / jnp.float32(max(n, 0) or jnp.nan)
        return loss.astype(out_dtype)

    if n % LANES == 0:
        # Fast path: zero-copy lane-dense (n//128, 128) view of the flat data.
        p2 = jnp.ravel(pred).reshape(n // LANES, LANES)
        t2 = jnp.ravel(target).reshape(n // LANES, LANES)
        total = _sum_sq_diff_2d(p2, t2)
    elif pred.ndim >= 2 and pred.shape[-1] <= MAX_RAGGED_COLS:
        # Ragged numel: zero-copy view collapsing leading dims (no pad, no
        # whole-array copy). Possibly lane-sparse (<128 lanes used) but the
        # kernel stays memory-bound and HBM traffic is exactly n elements.
        cols = pred.shape[-1]
        p2 = pred.reshape(-1, cols)
        t2 = target.reshape(-1, cols)
        total = _sum_sq_diff_2d(p2, t2)
    else:
        # 0-D / 1-D (or enormous last dim) with numel not a multiple of 128:
        # a fused XLA reduction is already bandwidth-optimal here.
        # TODO(synk): in-kernel 1-D tail handling for huge ragged 1-D inputs.
        d = pred.astype(jnp.float32) - target.astype(jnp.float32)
        total = jnp.sum(d * d)

    loss = total if reduction == "sum" else total / jnp.float32(n)
    return loss.astype(out_dtype)


if __name__ == "__main__":
    key = jax.random.PRNGKey(0)
    k1, k2, k3, k4, k5, k6, k7, k8 = jax.random.split(key, 8)

    # Heatmap-like shapes: batch=2, channels(joints)=4, spatial 16x16.
    pred = jax.random.normal(k1, (2, 4, 16, 16), dtype=jnp.float32)
    target = jax.random.normal(k2, (2, 4, 16, 16), dtype=jnp.float32)

    loss = jax.block_until_ready(mse_loss_pallas(pred, target, reduction="mean"))
    ref = jnp.mean(jnp.square(pred - target))
    assert jnp.allclose(loss, ref, rtol=1e-5, atol=1e-6), (loss, ref)

    loss_sum = jax.block_until_ready(mse_loss_pallas(pred, target, reduction="sum"))
    ref_sum = jnp.sum(jnp.square(pred - target))
    assert jnp.allclose(loss_sum, ref_sum, rtol=1e-5, atol=1e-4), (loss_sum, ref_sum)

    # Larger aligned shape: single big full-extent block.
    pred2 = jax.random.normal(k3, (2, 4, 144, 144), dtype=jnp.float32)
    target2 = jax.random.normal(k4, (2, 4, 144, 144), dtype=jnp.float32)
    loss2 = jax.block_until_ready(mse_loss_pallas(pred2, target2, reduction="mean"))
    ref2 = jnp.mean(jnp.square(pred2 - target2))
    assert jnp.allclose(loss2, ref2, rtol=1e-5, atol=1e-6), (loss2, ref2)

    # Multi-block grid with a partial (row-masked) boundary block.
    pred3 = jax.random.normal(k5, (2, 4, 272, 272), dtype=jnp.float32)
    target3 = jax.random.normal(k6, (2, 4, 272, 272), dtype=jnp.float32)
    loss3 = jax.block_until_ready(mse_loss_pallas(pred3, target3, reduction="mean"))
    ref3 = jnp.mean(jnp.square(pred3 - target3))
    assert jnp.allclose(loss3, ref3, rtol=1e-5, atol=1e-5), (loss3, ref3)

    # Ragged numel (not a multiple of 128): zero-copy last-dim view, no pad.
    pred4 = jax.random.normal(k7, (2, 3, 5, 7), dtype=jnp.float32)
    target4 = jax.random.normal(k8, (2, 3, 5, 7), dtype=jnp.float32)
    loss4 = jax.block_until_ready(mse_loss_pallas(pred4, target4, reduction="mean"))
    ref4 = jnp.mean(jnp.square(pred4 - target4))
    assert jnp.allclose(loss4, ref4, rtol=1e-5, atol=1e-6), (loss4, ref4)

    print("KERNEL_OK")
</pallas_src>

<mosaic_0001>
module attributes {stable_mosaic.version = 11 : i64} {
  func.func @_mse_partial_kernel(%arg0: i32, %arg1: i32, %arg2: memref<16x128xf32, #tpu.memory_space<vmem>>, %arg3: memref<16x128xf32, #tpu.memory_space<vmem>>, %arg4: memref<1x1xf32, #tpu.memory_space<smem>>, %arg5: memref<8x128xf32, #tpu.memory_space<vmem>>) attributes {dimension_semantics = [#tpu.dimension_semantics<parallel>, #tpu.dimension_semantics<arbitrary>], iteration_bounds = array<i64: 1, 1>, scalar_prefetch = 0 : i64, scratch_operands = 1 : i64, tpu.core_type = #tpu.core_type<tc>, window_params = [{transform_indices = @transform_0, window_bounds = array<i64: 16, 128>}, {transform_indices = @transform_1, window_bounds = array<i64: 16, 128>}, {transform_indices = @transform_2, window_bounds = array<i64: 1, 1>}]} {
    %c0_i32 = arith.constant 0 : i32
    %0 = arith.cmpi eq, %arg1, %c0_i32 : i32
    %1 = arith.extui %0 : i1 to i32
    %c0_i32_0 = arith.constant 0 : i32
    %2 = arith.cmpi ne, %1, %c0_i32_0 : i32
    scf.if %2 {
      %cst_10 = arith.constant 0.000000e+00 : f32
      %15 = vector.broadcast %cst_10 : f32 to vector<8x128xf32>
      %c0_11 = arith.constant 0 : index
      %c0_12 = arith.constant 0 : index
      %16 = vector.load %arg5[%c0_11, %c0_12] : memref<8x128xf32, #tpu.memory_space<vmem>>, vector<8x128xf32>
      tpu.vector_store %arg5[%c0_11, %c0_12], %15 {strides = array<i32>} : memref<8x128xf32, #tpu.memory_space<vmem>>, vector<8x128xf32>,
    } else {
    }
    %c0 = arith.constant 0 : index
    %c0_1 = arith.constant 0 : index
    %3 = vector.load %arg2[%c0, %c0_1] : memref<16x128xf32, #tpu.memory_space<vmem>>, vector<16x128xf32>
    %c0_2 = arith.constant 0 : index
    %c0_3 = arith.constant 0 : index
    %4 = vector.load %arg3[%c0_2, %c0_3] : memref<16x128xf32, #tpu.memory_space<vmem>>, vector<16x128xf32>
    %5 = arith.subf %3, %4 : vector<16x128xf32>
    %6 = arith.mulf %5, %5 : vector<16x128xf32>
    %c0_4 = arith.constant 0 : index
    %c0_5 = arith.constant 0 : index
    %7 = vector.load %arg5[%c0_4, %c0_5] : memref<8x128xf32, #tpu.memory_space<vmem>>, vector<8x128xf32>
    %8 = vector.shape_cast %6 : vector<16x128xf32> to vector<2x8x128xf32>
    %cst = arith.constant dense<0.000000e+00> : vector<8x128xf32>
    %9 = vector.multi_reduction <add>, %8, %cst [0] : vector<2x8x128xf32> to vector<8x128xf32>
    %10 = arith.addf %7, %9 : vector<8x128xf32>
    %c0_6 = arith.constant 0 : index
    %c0_7 = arith.constant 0 : index
    %11 = vector.load %arg5[%c0_6, %c0_7] : memref<8x128xf32, #tpu.memory_space<vmem>>, vector<8x128xf32>
    tpu.vector_store %arg5[%c0_6, %c0_7], %10 {strides = array<i32>} : memref<8x128xf32, #tpu.memory_space<vmem>>, vector<8x128xf32>,
    %c0_i32_8 = arith.constant 0 : i32
    %12 = arith.cmpi eq, %arg1, %c0_i32_8 : i32
    %13 = arith.extui %12 : i1 to i32
    %c0_i32_9 = arith.constant 0 : i32
    %14 = arith.cmpi ne, %13, %c0_i32_9 : i32
    scf.if %14 {
      %c0_10 = arith.constant 0 : index
      %c0_11 = arith.constant 0 : index
      %15 = vector.load %arg5[%c0_10, %c0_11] : memref<8x128xf32, #tpu.memory_space<vmem>>, vector<8x128xf32>
      %16 = vector.shape_cast %15 : vector<8x128xf32> to vector<1x8x128xf32>
      %cst_12 = arith.constant dense<0.000000e+00> : vector<1xf32>
      %17 = vector.multi_reduction <add>, %16, %cst_12 [1, 2] : vector<1x8x128xf32> to vector<1xf32>
      %18 = vector.shape_cast %17 : vector<1xf32> to vector<1x1x1xf32>
      %19 = vector.extract %18[0, 0, 0] : f32 from vector<1x1x1xf32>
      %c0_13 = arith.constant 0 : index
      %c0_14 = arith.constant 0 : index
      %20 = memref.load %arg4[%c0_13, %c0_14] : memref<1x1xf32, #tpu.memory_space<smem>>
      memref.store %19, %arg4[%c0_13, %c0_14] : memref<1x1xf32, #tpu.memory_space<smem>>
    } else {
    }
    return
  }
  func.func @transform_0(%arg0: i32, %arg1: i32) -> (i32, i32) {
    %c1_i32 = arith.constant 1 : i32
    %0 = arith.muli %arg0, %c1_i32 : i32
    %1 = arith.addi %0, %arg1 : i32
    %c0_i32 = arith.constant 0 : i32
    %2 = arith.minsi %1, %c0_i32 : i32
    %c0_i32_0 = arith.constant 0 : i32
    %c0_i32_1 = arith.constant 0 : i32
    return %2, %c0_i32_0 : i32, i32
  }
  func.func @transform_1(%arg0: i32, %arg1: i32) -> (i32, i32) {
    %c1_i32 = arith.constant 1 : i32
    %0 = arith.muli %arg0, %c1_i32 : i32
    %1 = arith.addi %0, %arg1 : i32
    %c0_i32 = arith.constant 0 : i32
    %2 = arith.minsi %1, %c0_i32 : i32
    %c0_i32_0 = arith.constant 0 : i32
    %c0_i32_1 = arith.constant 0 : i32
    return %2, %c0_i32_0 : i32, i32
  }
  func.func @transform_2(%arg0: i32, %arg1: i32) -> (i32, i32) {
    %c0_i32 = arith.constant 0 : i32
    %c0_i32_0 = arith.constant 0 : i32
    return %arg0, %c0_i32 : i32, i32
  }
}

</mosaic_0001>

<bundles_post_ra>
// kernel: tpu_custom_call.1
= control target key start
LH: loop header
LB: loop body
LE: loop exit
PB: predicated region body
PF: predicated region fallthrough
CT: control target
= control target key end

     0   :  { %7 = vsyncpa [#allocation4], 0  ;;  %s234_s0 = inlined_call_operand.hbm [shape: f32[16,128], index: 0, kind: input, shape index: {}]   ;;  %s235_s1 = inlined_call_operand.hbm [shape: f32[16,128], index: 1, kind: input, shape index: {}]   ;;  %s236_s2 = inlined_call_operand.hbm [shape: f32[1,1], index: 2, kind: output, shape index: {}]  }
   0x1   :  { %8 = vsyncpa [#allocation7], 0 }
   0x2   :  { %9 = vsyncpa [#allocation5], 0  ;;  %s178_s9 = smov [#allocation3]   ;;  %s118_s13 = scalar_lea.hbm %s234_s0, 256 }
   0x3   :  { %s21_s10 = sshll.u32 %s178_s9, 4  ;;  %p119_p0 = scmp.ne.s32.totalorder %s234_s0, %s118_s13  ;;  %s22_s10 = int_to_ptr.vmem [resolvable:$true] %s21_s10 }
   0x4   :  { %p122_p1 = scmp.lt.u32.totalorder %s118_s13, %s234_s0 }
   0x6   :  { %p124_p2 = pnand %p122_p1, %p119_p0 }
   0x8   :  { %127 = shalt.err (!%p124_p2)
}
   0x9   :  { %s128_s18 = scalar_lea.vmem %s22_s10, 256  ;;  %p133_p4 = scmp.lt.s32.totalorder %s22_s10, %s22_s10 }
   0xa   :  { %p129_p3 = scmp.ne.s32.totalorder %s22_s10, %s128_s18  ;;  %p134_p5 = scmp.lt.s32.totalorder %s128_s18, %s128_s18 }
   0xc   :  { %p135_p6 = por %p134_p5, %p133_p4 }
   0xe   :  { %p136_p7 = pnand %p135_p6, %p129_p3 }
  0x10   :  { %139 = shalt.err (!%p136_p7)
}
  0x11   :  { %s179_s19 = smov 128   ;;  %s180_s20 = smov 8  }
  0x12   :  { %27 = dma.hbm_to_vmem [thread:$0]  %s234_s0, 256, %s22_s10, [#allocation4], %s179_s19, %s179_s19, %s180_s20  }
  0x13   :  { %s181_s23 = smov [#allocation6]   ;;  %s140_s27 = scalar_lea.hbm %s235_s1, 256 }
  0x14   :  { %s39_s24 = sshll.u32 %s181_s23, 4  ;;  %p141_p8 = scmp.ne.s32.totalorder %s235_s1, %s140_s27  ;;  %s40_s24 = int_to_ptr.vmem [resolvable:$true] %s39_s24 }
  0x15   :  { %p144_p9 = scmp.lt.u32.totalorder %s140_s27, %s235_s1 }
  0x17   :  { %p146_p10 = pnand %p144_p9, %p141_p8 }
  0x19   :  { %149 = shalt.err (!%p146_p10)
}
  0x1a   :  { %s150_s4 = scalar_lea.vmem %s40_s24, 256  ;;  %p155_p12 = scmp.lt.s32.totalorder %s40_s24, %s40_s24 }
  0x1b   :  { %p151_p11 = scmp.ne.s32.totalorder %s40_s24, %s150_s4  ;;  %p156_p13 = scmp.lt.s32.totalorder %s150_s4, %s150_s4 }
  0x1d   :  { %p157_p0 = por %p156_p13, %p155_p12 }
  0x1f   :  { %p158_p1 = pnand %p157_p0, %p151_p11 }
  0x21   :  { %161 = shalt.err (!%p158_p1)
}
  0x22   :  { %45 = dma.hbm_to_vmem [thread:$0]  %s235_s1, 256, %s40_s24, [#allocation7], %s179_s19, %s179_s19, %s180_s20  }
  0x23   :  { %172 = dma.done.wait [#allocation4], 256  }
  0x24   :  { %173 = vsyncadd [#allocation4], 4294967040 }
  0x25   :  { %174 = dma.done.wait [#allocation7], 256  }
  0x26   :  { %175 = vsyncadd [#allocation7], 4294967040  ;;  %v65_v0 = vld [vmem:[#allocation3] sm:$0xff]  ;;  %v66_v1 = vld [vmem:[#allocation3 + $0x8] sm:$0xff]  ;;  %s162_s8 = scalar_lea.hbm %s236_s2, 16 }
  0x27   :  { %v67_v2 = vld [vmem:[#allocation6] sm:$0xff]  ;;  %v68_v3 = vld [vmem:[#allocation6 + $0x8] sm:$0xff]  ;;  %p163_p2 = scmp.ne.s32.totalorder %s236_s2, %s162_s8  ;;  %p166_p3 = scmp.lt.u32.totalorder %s162_s8, %s236_s2 }
  0x28   :  { %v69_v4 = vsub.f32 %v65_v0, %v67_v2  ;;  %v70_v5 = vsub.f32 %v66_v1, %v68_v3 }
  0x29   :  { %p168_p4 = pnand %p166_p3, %p163_p2 }
  0x2a   :  { %v71_v6 = vmul.f32 %v69_v4, %v69_v4  ;;  %v72_v7 = vmul.f32 %v70_v5, %v70_v5 }
  0x2c   :  { %v74_v8 = vadd.f32 %v72_v7, %v71_v6 }
  0x2e   :  { %81 = vadd.xlane.f32.xlu0 %v74_v8 }
  0xbb   :  { %v82_v9 = vpop.xlane.xlu0 %81 }
  0xbc   :  { %v83_v10 = vrot.slane %v82_v9, 4 }
  0xbe   :  { %v84_v11 = vadd.f32 %v83_v10, %v82_v9 }
  0xc0   :  { %v85_v12 = vrot.slane %v84_v11, 2 }
  0xc2   :  { %v86_v13 = vadd.f32 %v85_v12, %v84_v11 }
  0xc4   :  { %v87_v14 = vrot.slane %v86_v13, 1 }
  0xc6   :  { %v88_v15 = vadd.f32 %v87_v14, %v86_v13 }
  0xc8   :  { %111 = vpush %v88_v15 }
  0xf9   :  { %s112_s1 = spop %111 }
  0xfa   :  { %91 = sst [smem:[#allocation8]] %s112_s1 }
  0xfb   :  { %171 = shalt.err (!%p168_p4)
}
  0xfc   :  { %s182_s13 = smov [#allocation8]  }
  0xfd   :  { %99 = dma.smem_to_hbm %s182_s13, 16, %s236_s2, [#allocation5]  }
  0xfe   :  { %176 = dma.done.wait [#allocation5], 16  }
  0xff   :  { %177 = vsyncadd [#allocation5], 4294967280 }
 0x100   :  { %103 = sfence }
 0x101   :  { %104 = vsyncpa [#allocation4], 1 }
 0x102   :  { %105 = vsyncpa [#allocation7], 1 }
 0x103   :  { %106 = vsyncpa [#allocation5], 1 }

</bundles_post_ra>
